<compile_context>
chip_gen: v5e
topology: v5e:2x2
jax: 0.10.0
libtpu: 0.0.40
codegen_flags: <defaults>
</compile_context>

<pallas_src>
import functools

import jax
import jax.numpy as jnp
from jax import lax
from jax.experimental import pallas as pl
from jax.experimental.pallas import tpu as pltpu

_EPS = 1e-12  # torch.nn.functional.normalize default eps


def _round_up(x, m):
    return (x + m - 1) // m * m


def _cdiv(a, b):
    return (a + b - 1) // b


def _l2_normalize(x):
    # row-wise x / max(||x||, eps)  ==  x * rsqrt(max(sum(x^2), eps^2))
    # (rsqrt goes to the EUP slot; avoids sqrt + full-tensor divide).
    sumsq = jnp.sum(x * x, axis=1, keepdims=True)
    return x * lax.rsqrt(jnp.maximum(sumsq, jnp.float32(_EPS * _EPS)))


def _dot_t(a, b):
    # a @ b.T without materializing b.T: contract the last dim of both operands.
    return lax.dot_general(a, b, dimension_numbers=(((1,), (1,)), ((), ())),
                           preferred_element_type=jnp.float32)


# ---------------------------------------------------------------------------
# Kernel 1: batch-independent prototype pass (runs once).
# ---------------------------------------------------------------------------
def _proto_kernel(num_protos, proto_ref, w_ref, sign_ref,
                  pnorm_ref, wcl_ref, lp3_ref):
    protos = proto_ref[...].astype(jnp.float32)
    pnorm = _l2_normalize(protos)                      # f32 numerics
    pnorm_ref[...] = pnorm.astype(pnorm_ref.dtype)     # stored in matmul_dtype

    # prototype similarity (padded rows are zero vectors -> zero similarity,
    # masked out together with the strict-upper-triangle condition).
    sim = _dot_t(pnorm, pnorm)                         # (Pp, Pp) f32
    pp = sim.shape[0]
    rows = lax.broadcasted_iota(jnp.int32, (pp, pp), 0)
    cols = lax.broadcasted_iota(jnp.int32, (pp, pp), 1)
    valid = (cols > rows) & (rows < num_protos) & (cols < num_protos)
    # guard: pair count is 0 when num_protos < 2 (reference would emit nan)
    num_pairs = jnp.float32(max(num_protos * (num_protos - 1) / 2.0, 1.0))
    lp3_ref[0] = jnp.sum(jnp.where(valid, 1.0 + sim, 0.0)) / num_pairs

    # PolarizedClassificationLayer weight clamp (sign-constrained).
    w = w_ref[...].astype(jnp.float32)
    sign = sign_ref[...].astype(jnp.float32)
    wcl = jnp.where(sign > 0, jnp.maximum(w, 0.0), jnp.minimum(w, 0.0))
    wcl_ref[...] = wcl.astype(wcl_ref.dtype)           # stored in matmul_dtype


# ---------------------------------------------------------------------------
# Kernel 2: batch-tiled pass, grid=(batch tiles "parallel", K tiles "arbitrary")
# ---------------------------------------------------------------------------
def _batch_kernel(matmul_dtype, x_ref, hw_ref, hb_ref, pnorm_ref, wcl_ref,
                  logits_ref, acts_ref, clsnorm_ref, acc_ref):
    k = pl.program_id(1)

    @pl.when(k == 0)
    def _():
        acc_ref[...] = jnp.zeros_like(acc_ref)

    # backbone stub partial matmul for this K tile: rep += x_k @ head_w_k.T
    # (operands already in matmul_dtype -> no per-step casts; f32 accumulate)
    acc_ref[...] += _dot_t(x_ref[...], hw_ref[...])

    @pl.when(k == pl.num_programs(1) - 1)
    def _():
        rep = acc_ref[...] + hb_ref[...].astype(jnp.float32)
        rep_norm = _l2_normalize(rep)                            # f32
        clsnorm_ref[...] = rep_norm.astype(clsnorm_ref.dtype)

        # prototype activations (single down-cast of the tile, then MXU-native)
        acts = _dot_t(rep_norm.astype(matmul_dtype), pnorm_ref[...])
        acts_ref[...] = acts

        # polarized (bias-free) classification
        logits_ref[...] = _dot_t(acts.astype(matmul_dtype), wcl_ref[...])


def lmprotonet_forward(llm_encodings, head_w, head_b, prototypes,
                       cls_weight, sign_matrix, *, tile_m=512, tile_k=512,
                       k_tiling_threshold=2048, matmul_dtype=jnp.bfloat16):
    """Forward pass of LMProtoNet (with a linear backbone stub).

    matmul_dtype=bf16 (default) stores x/head_w/proto_norm/w_clamped in bf16,
    halving HBM<->VMEM traffic and running the MXU at native rate; all
    normalizations, accumulations and losses stay in f32.  Pass f32 for exact
    module numerics.
    """
    B, latent = llm_encodings.shape
    P, Dp = prototypes.shape
    C = cls_weight.shape[0]
    f32 = jnp.float32

    mm_bytes = jnp.dtype(matmul_dtype).itemsize
    align = {4: 8, 2: 16, 1: 32}.get(mm_bytes, 8)   # sublane packing of dtype

    # ---- lane-dense padding of feature dims (only when actually needed) ----
    # NOTE: on v6e/v7x prefer 256-multiples for Dp/P once true dims exceed 128
    # (256-wide MXU); the toy config is unaffected.
    Dpp = _round_up(Dp, 128)
    Pp = _round_up(P, 128)
    Cp = _round_up(C, 128)

    # latent (K) tiling: bounds VMEM independent of encoder width.
    if latent > k_tiling_threshold:
        TK = min(_round_up(tile_k, 128), _round_up(latent, 128))
        Lp = _round_up(latent, TK)
    else:
        Lp = _round_up(latent, 128)
        TK = Lp
    KG = Lp // TK

    # ---- generation-aware VMEM budget -> batch tile size --------------------
    try:
        vmem_cap = int(pltpu.get_tpu_info().vmem_capacity_bytes)
    except Exception:
        vmem_cap = 64 * 1024 * 1024                 # conservative (v7x per-TC)
    vmem_budget = int(vmem_cap * 0.8)               # ~20% headroom

    hw_bufs = 1 if KG == 1 else 2                   # head_w invariant iff not K-tiled
    fixed_bytes = (hw_bufs * Dpp * TK * mm_bytes    # head_w
                   + Dpp * 4                        # head_b (f32, single buffer)
                   + Pp * Dpp * mm_bytes            # proto_norm (single buffer)
                   + Cp * Pp * mm_bytes)            # w_clamped (single buffer)
    per_row_bytes = (2 * TK * mm_bytes              # x tile (double buffered)
                     + 2 * Cp * 4                   # logits out
                     + 2 * Pp * 4                   # acts out
                     + 2 * Dpp * mm_bytes           # cls_rep_normalized out
                     + Dpp * 4                      # f32 accumulator scratch
                     + 3 * Dpp * 4 + Pp * 4)        # compiler f32 temporaries
    tm_budget = max((vmem_budget - fixed_bytes) // per_row_bytes, align)
    tm_budget = max((tm_budget // align) * align, align)
    tm_cap = max(align, min(_round_up(tile_m, align), tm_budget))

    Bp_min = _round_up(B, align)
    if Bp_min <= tm_cap:
        # Whole batch fits in one tile; split in two when possible so the
        # "parallel" batch axis actually feeds both v7x TensorCores.
        TM = _round_up(_cdiv(Bp_min, 2), align) if Bp_min > align else Bp_min
    else:
        TM = tm_cap
    Bp = _round_up(B, TM)
    G = Bp // TM

    def maybe_pad(a, rows, cols, dtype):
        a = a.astype(dtype)
        pr, pc = rows - a.shape[0], cols - a.shape[1]
        if pr or pc:                                # skip the copy when aligned
            a = jnp.pad(a, ((0, pr), (0, pc)))
        return a

    x_p = maybe_pad(llm_encodings, Bp, Lp, matmul_dtype)   # bf16 in HBM
    hw_p = maybe_pad(head_w, Dpp, Lp, matmul_dtype)
    hb_p = maybe_pad(head_b.reshape(1, -1), 1, Dpp, f32)
    proto_p = maybe_pad(prototypes, Pp, Dpp, f32)
    w_p = maybe_pad(cls_weight, Cp, Pp, f32)
    sign_p = maybe_pad(sign_matrix, Cp, Pp, f32)

    vmem = pl.BlockSpec(memory_space=pltpu.VMEM)
    smem = pl.BlockSpec(memory_space=pltpu.SMEM)

    # ---- pass 1: prototype-only work (hoisted out of the batch loop) --------
    proto_norm, w_clamped, lp3 = pl.pallas_call(
        functools.partial(_proto_kernel, P),
        out_shape=(
            jax.ShapeDtypeStruct((Pp, Dpp), matmul_dtype),  # normalized prototypes
            jax.ShapeDtypeStruct((Cp, Pp), matmul_dtype),   # clamped classifier weight
            jax.ShapeDtypeStruct((1,), f32),                # l_p3 (scalar, SMEM)
        ),
        in_specs=[vmem, vmem, vmem],
        out_specs=(vmem, vmem, smem),
    )(proto_p, w_p, sign_p)

    # ---- pass 2: batch-tiled, pipelined --------------------------------------
    def run_batch(single_buffer_invariants):
        def inv_spec(shape, index_map):
            if single_buffer_invariants:
                return pl.BlockSpec(shape, index_map,
                                    pipeline_mode=pl.Buffered(1))
            return pl.BlockSpec(shape, index_map)

        hw_map = lambda i, k: (0, k)
        hw_spec = (inv_spec((Dpp, TK), hw_map) if KG == 1
                   else pl.BlockSpec((Dpp, TK), hw_map))

        grid_spec = pltpu.PrefetchScalarGridSpec(
            num_scalar_prefetch=0,
            grid=(G, KG),
            in_specs=[
                pl.BlockSpec((TM, TK), lambda i, k: (i, k)),      # x (streaming)
                hw_spec,                                          # head_w
                inv_spec((1, Dpp), lambda i, k: (0, 0)),          # head_b
                inv_spec((Pp, Dpp), lambda i, k: (0, 0)),         # proto_norm
                inv_spec((Cp, Pp), lambda i, k: (0, 0)),          # w_clamped
            ],
            out_specs=(
                pl.BlockSpec((TM, Cp), lambda i, k: (i, 0)),      # logits
                pl.BlockSpec((TM, Pp), lambda i, k: (i, 0)),      # acts
                pl.BlockSpec((TM, Dpp), lambda i, k: (i, 0)),     # cls_rep_norm
            ),
            scratch_shapes=[pltpu.VMEM((TM, Dpp), f32)],          # rep accumulator
        )

        return pl.pallas_call(
            functools.partial(_batch_kernel, matmul_dtype),
            out_shape=(
                jax.ShapeDtypeStruct((Bp, Cp), f32),
                jax.ShapeDtypeStruct((Bp, Pp), f32),
                jax.ShapeDtypeStruct((Bp, Dpp), matmul_dtype),
            ),
            grid_spec=grid_spec,
            compiler_params=pltpu.CompilerParams(
                dimension_semantics=("parallel", "arbitrary"),
                vmem_limit_bytes=vmem_budget,
            ),
        )(x_p, hw_p, hb_p, proto_norm, w_clamped)

    try:
        logits_p, acts_p, clsnorm_p = run_batch(True)
    except Exception:
        # pipeline_mode=pl.Buffered(1) unsupported on this JAX build; fall back
        # to default double-buffered invariants (perf-only difference).
        logits_p, acts_p, clsnorm_p = run_batch(False)

    # strip padding
    logits = logits_p[:B, :C]
    acts = acts_p[:B, :P]
    cls_rep_norm = clsnorm_p[:B, :Dp]

    # l_p1 / l_p2: reductions of the tiny (B, P) acts matrix, finalized here so
    # the batch grid axis stays "parallel" (no cross-tile accumulators).
    # min(1 - a) == 1 - max(a).
    lp1 = 1.0 - jnp.mean(jnp.max(acts, axis=0))
    lp2 = 1.0 - jnp.mean(jnp.max(acts, axis=1))

    return {
        "logits": logits,
        "acts": acts,
        "cls_rep_normalized": cls_rep_norm,
        "l_p1": lp1,
        "l_p2": lp2,
        "l_p3": lp3[0],
    }


def _reference(llm_encodings, head_w, head_b, prototypes, cls_weight, sign_matrix):
    rep = llm_encodings @ head_w.T + head_b
    rn = rep / jnp.maximum(jnp.linalg.norm(rep, axis=1, keepdims=True), 1e-12)
    pn = prototypes / jnp.maximum(jnp.linalg.norm(prototypes, axis=1, keepdims=True), 1e-12)
    acts = rn @ pn.T
    la = 1.0 - acts
    lp1 = jnp.min(la, axis=0).mean()
    lp2 = jnp.min(la, axis=1).mean()
    sim = pn @ pn.T
    P = sim.shape[0]
    mask = jnp.triu(jnp.ones((P, P), bool), k=1)
    lp3 = jnp.sum(jnp.where(mask, 1.0 + sim, 0.0)) / (P * (P - 1) / 2)
    wc = jnp.where(sign_matrix > 0, jnp.maximum(cls_weight, 0.0), jnp.minimum(cls_weight, 0.0))
    logits = acts @ wc.T
    return logits, acts, rn, lp1, lp2, lp3


if __name__ == "__main__":
    # small synthetic config consistent with the module
    B, LATENT = 8, 32              # batch, backbone input width
    PROTO_DIM = 32                 # prototype dim (llm head output)
    NUM_LABELS, NUM_PROTOS = 2, 5
    P = NUM_LABELS * NUM_PROTOS    # total prototypes = 10

    key = jax.random.PRNGKey(0)
    k_x, k_hw, k_hb, k_proto = jax.random.split(key, 4)

    llm_encodings = jax.random.normal(k_x, (B, LATENT), jnp.float32)

    # backbone stub parameters (deterministic)
    head_w = jax.random.normal(k_hw, (PROTO_DIM, LATENT), jnp.float32) * 0.1
    head_b = jax.random.normal(k_hb, (PROTO_DIM,), jnp.float32) * 0.01

    # prototypes: xavier_uniform_ on (P, PROTO_DIM)
    bound = (6.0 / (PROTO_DIM + P)) ** 0.5
    prototypes = jax.random.uniform(k_proto, (P, PROTO_DIM), jnp.float32, -bound, bound)

    # PolarizedClassificationLayer: sign matrix, weight initialized to it
    sign_matrix = -jnp.ones((NUM_LABELS, P), jnp.float32)
    cls_idx = jnp.arange(P) // NUM_PROTOS
    sign_matrix = sign_matrix.at[cls_idx, jnp.arange(P)].set(1.0)
    cls_weight = sign_matrix

    ref_logits, ref_acts, ref_rn, ref_lp1, ref_lp2, ref_lp3 = _reference(
        llm_encodings, head_w, head_b, prototypes, cls_weight, sign_matrix)

    # --- exact-numerics path (f32 matmuls): strict check against reference ---
    out32 = lmprotonet_forward(llm_encodings, head_w, head_b, prototypes,
                               cls_weight, sign_matrix,
                               matmul_dtype=jnp.float32)
    jax.block_until_ready(out32)
    assert jnp.allclose(out32["logits"], ref_logits, atol=1e-5)
    assert jnp.allclose(out32["acts"], ref_acts, atol=1e-5)
    assert jnp.allclose(out32["cls_rep_normalized"], ref_rn, atol=1e-5)
    assert jnp.allclose(out32["l_p1"], ref_lp1, atol=1e-5)
    assert jnp.allclose(out32["l_p2"], ref_lp2, atol=1e-5)
    assert jnp.allclose(out32["l_p3"], ref_lp3, atol=1e-5)

    # --- default fast path (bf16 operands, f32 accumulate): loose check ------
    out16 = lmprotonet_forward(llm_encodings, head_w, head_b, prototypes,
                               cls_weight, sign_matrix)
    jax.block_until_ready(out16)
    assert jnp.allclose(out16["logits"].astype(jnp.float32), ref_logits, atol=2e-1)
    assert jnp.allclose(out16["acts"].astype(jnp.float32), ref_acts, atol=5e-2)
    assert jnp.allclose(out16["cls_rep_normalized"].astype(jnp.float32), ref_rn, atol=5e-2)
    assert jnp.allclose(out16["l_p1"], ref_lp1, atol=5e-2)
    assert jnp.allclose(out16["l_p2"], ref_lp2, atol=5e-2)
    assert jnp.allclose(out16["l_p3"], ref_lp3, atol=1e-4)

    print("KERNEL_OK")
</pallas_src>

<mosaic_0001>
module attributes {stable_mosaic.version = 11 : i64} {
  func.func @_proto_kernel(%arg0: memref<128x128xf32, #tpu.memory_space<vmem>>, %arg1: memref<128x128xf32, #tpu.memory_space<vmem>>, %arg2: memref<128x128xf32, #tpu.memory_space<vmem>>, %arg3: memref<128x128xf32, #tpu.memory_space<vmem>>, %arg4: memref<128x128xf32, #tpu.memory_space<vmem>>, %arg5: memref<1xf32, #tpu.memory_space<smem>>) attributes {dimension_semantics = [], scalar_prefetch = 0 : i64, scratch_operands = 0 : i64, tpu.core_type = #tpu.core_type<tc>} {
    %c0 = arith.constant 0 : index
    %c0_0 = arith.constant 0 : index
    %0 = vector.load %arg0[%c0, %c0_0] : memref<128x128xf32, #tpu.memory_space<vmem>>, vector<128x128xf32>
    %1 = arith.mulf %0, %0 : vector<128x128xf32>
    %cst = arith.constant dense<0.000000e+00> : vector<128xf32>
    %2 = vector.multi_reduction <add>, %1, %cst [1] : vector<128x128xf32> to vector<128xf32>
    %3 = vector.shape_cast %2 : vector<128xf32> to vector<128x1xf32>
    %cst_1 = arith.constant 1.000000e-24 : f32
    %4 = vector.broadcast %cst_1 : f32 to vector<128x1xf32>
    %5 = arith.maximumf %3, %4 : vector<128x1xf32>
    %6 = math.rsqrt %5 : vector<128x1xf32>
    %7 = vector.broadcast %6 : vector<128x1xf32> to vector<128x128xf32>
    %8 = arith.mulf %0, %7 : vector<128x128xf32>
    %c0_2 = arith.constant 0 : index
    %c0_3 = arith.constant 0 : index
    %9 = vector.load %arg3[%c0_2, %c0_3] : memref<128x128xf32, #tpu.memory_space<vmem>>, vector<128x128xf32>
    tpu.vector_store %arg3[%c0_2, %c0_3], %8 {strides = array<i32>} : memref<128x128xf32, #tpu.memory_space<vmem>>, vector<128x128xf32>,
    %cst_4 = arith.constant dense<0.000000e+00> : vector<128x128xf32>
    %10 = tpu.matmul %8, %8, %cst_4 {dimension_numbers = #tpu.dot_dimension_numbers<[1], [1], [0], [0], [0, 0, 1, 0], [], []>} : vector<128x128xf32>, vector<128x128xf32>, vector<128x128xf32> -> vector<128x128xf32>
    %11 = tpu.iota {dimensions = array<i32: 0>} : vector<128x128xi32>
    %12 = tpu.iota {dimensions = array<i32: 1>} : vector<128x128xi32>
    %13 = arith.cmpi sgt, %12, %11 : vector<128x128xi32>
    %c10_i32 = arith.constant 10 : i32
    %14 = vector.broadcast %c10_i32 : i32 to vector<128x128xi32>
    %15 = arith.cmpi slt, %11, %14 : vector<128x128xi32>
    %16 = arith.andi %13, %15 : vector<128x128xi1>
    %c10_i32_5 = arith.constant 10 : i32
    %17 = vector.broadcast %c10_i32_5 : i32 to vector<128x128xi32>
    %18 = arith.cmpi slt, %12, %17 : vector<128x128xi32>
    %19 = arith.andi %16, %18 : vector<128x128xi1>
    %cst_6 = arith.constant 1.000000e+00 : f32
    %20 = vector.broadcast %cst_6 : f32 to vector<128x128xf32>
    %21 = arith.addf %20, %10 : vector<128x128xf32>
    %cst_7 = arith.constant 0.000000e+00 : f32
    %22 = vector.broadcast %cst_7 : f32 to vector<128x128xf32>
    %23 = arith.select %19, %21, %22 : vector<128x128xi1>, vector<128x128xf32>
    %24 = vector.shape_cast %23 : vector<128x128xf32> to vector<1x128x128xf32>
    %cst_8 = arith.constant dense<0.000000e+00> : vector<1xf32>
    %25 = vector.multi_reduction <add>, %24, %cst_8 [1, 2] : vector<1x128x128xf32> to vector<1xf32>
    %26 = vector.shape_cast %25 : vector<1xf32> to vector<1x1x1xf32>
    %27 = vector.extract %26[0, 0, 0] : f32 from vector<1x1x1xf32>
    %cst_9 = arith.constant 4.500000e+01 : f32
    %28 = arith.divf %27, %cst_9 : f32
    %c0_10 = arith.constant 0 : index
    %29 = memref.load %arg5[%c0_10] : memref<1xf32, #tpu.memory_space<smem>>
    memref.store %28, %arg5[%c0_10] : memref<1xf32, #tpu.memory_space<smem>>
    %c0_11 = arith.constant 0 : index
    %c0_12 = arith.constant 0 : index
    %30 = vector.load %arg1[%c0_11, %c0_12] : memref<128x128xf32, #tpu.memory_space<vmem>>, vector<128x128xf32>
    %c0_13 = arith.constant 0 : index
    %c0_14 = arith.constant 0 : index
    %31 = vector.load %arg2[%c0_13, %c0_14] : memref<128x128xf32, #tpu.memory_space<vmem>>, vector<128x128xf32>
    %cst_15 = arith.constant 0.000000e+00 : f32
    %32 = vector.broadcast %cst_15 : f32 to vector<128x128xf32>
    %33 = arith.cmpf ogt, %31, %32 : vector<128x128xf32>
    %cst_16 = arith.constant 0.000000e+00 : f32
    %34 = vector.broadcast %cst_16 : f32 to vector<128x128xf32>
    %35 = arith.maximumf %30, %34 : vector<128x128xf32>
    %cst_17 = arith.constant 0.000000e+00 : f32
    %36 = vector.broadcast %cst_17 : f32 to vector<128x128xf32>
    %37 = arith.minimumf %30, %36 : vector<128x128xf32>
    %38 = arith.select %33, %35, %37 : vector<128x128xi1>, vector<128x128xf32>
    %c0_18 = arith.constant 0 : index
    %c0_19 = arith.constant 0 : index
    %39 = vector.load %arg4[%c0_18, %c0_19] : memref<128x128xf32, #tpu.memory_space<vmem>>, vector<128x128xf32>
    tpu.vector_store %arg4[%c0_18, %c0_19], %38 {strides = array<i32>} : memref<128x128xf32, #tpu.memory_space<vmem>>, vector<128x128xf32>,
    return
  }
}

</mosaic_0001>

<bundles_post_ra>
// kernel: tpu_custom_call.1
= control target key start
LH: loop header
LB: loop body
LE: loop exit
PB: predicated region body
PF: predicated region fallthrough
CT: control target
= control target key end

     0   :  { %11 = vsyncpa [#allocation3], 0  ;;  %s1456_s0 = inlined_call_operand.hbm [shape: f32[128,128], index: 0, kind: input, shape index: {}]   ;;  %s1457_s1 = inlined_call_operand.hbm [shape: f32[128,128], index: 1, kind: input, shape index: {}]   ;;  %s1458_s2 = inlined_call_operand.hbm [shape: f32[128,128], index: 2, kind: input, shape index: {}]   ;;  %s1459_s3 = inlined_call_operand.hbm [shape: f32[128,128], index: 3, kind: output, shape index: {0}]   ;;  %s1460_s4 = inlined_call_operand.hbm [shape: f32[128,128], index: 4, kind: output, shape index: {1}]   ;;  %s1461_s5 = inlined_call_operand.hbm [shape: f32[1], index: 5, kind: output, shape index: {2}]  }
   0x1   :  { %12 = vsyncpa [#allocation7], 0 }
   0x2   :  { %13 = vsyncpa [#allocation4], 0 }
   0x3   :  { %14 = vsyncpa [#allocation11], 0 }
   0x4   :  { %15 = vsyncpa [#allocation5], 0  ;;  %s33_s20 = sshll.u32 %s1457_s1, 4  ;;  %s941_s21 = smov [#allocation6]   ;;  %s34_s20 = int_to_ptr.hbm [resolvable:$true] %s33_s20 }
   0x5   :  { %s35_s22 = sshll.u32 %s941_s21, 4  ;;  %s20_s25 = sshll.u32 %s1456_s0, 4  ;;  %s36_s22 = int_to_ptr.vmem [resolvable:$true] %s35_s22  ;;  %s21_s25 = int_to_ptr.hbm [resolvable:$true] %s20_s25 }
   0x6   :  { %s942_s26 = smov 128   ;;  %s943_s27 = smov 8  }
   0x7   :  { %41 = dma.hbm_to_vmem [thread:$0]  %s34_s20, 2048, %s36_s22, [#allocation7], %s942_s26, %s942_s26, %s943_s27  }
   0x8   :  { %s944_s28 = smov [#allocation2]   ;;  %s46_s1 = sshll.u32 %s1458_s2, 4  ;;  %s47_s1 = int_to_ptr.hbm [resolvable:$true] %s46_s1 }
   0x9   :  { %s22_s29 = sshll.u32 %s944_s28, 4  ;;  %s945_s0 = smov [#allocation8]   ;;  %s23_s29 = int_to_ptr.vmem [resolvable:$true] %s22_s29 }
   0xa   :  { %28 = dma.hbm_to_vmem [thread:$0]  %s21_s25, 2048, %s23_s29, [#allocation3], %s942_s26, %s942_s26, %s943_s27  }
   0xb   :  { %s48_s7 = sshll.u32 %s945_s0, 4  ;;  %s49_s7 = int_to_ptr.vmem [resolvable:$true] %s48_s7 }
   0xc   :  { %54 = dma.hbm_to_vmem [thread:$0]  %s47_s1, 2048, %s49_s7, [#allocation7], %s942_s26, %s942_s26, %s943_s27  }
   0xd   :  { %931 = dma.done.wait [#allocation3], 2048  }
   0xe   :  { %932 = vsyncadd [#allocation3], 4294965248 }
   0xf   :  { %933 = dma.done.wait [#allocation7], 4096  }
  0x10   :  { %934 = vsyncadd [#allocation7], 4294963200  ;;  %v998_v0 = vld [vmem:[#allocation2 + $0x78] sm:$0xff]  ;;  %v1000_v1 = vld [vmem:[#allocation2 + $0x68] sm:$0xff]  ;;  %s657_s9 = sshll.u32 %s1459_s3, 4  ;;  %s946_s10 = smov [#allocation9]   ;;  %s658_s9 = int_to_ptr.hbm [resolvable:$true] %s657_s9 }
  0x11   :  { %v1002_v2 = vld [vmem:[#allocation2 + $0x58] sm:$0xff]  ;;  %v98_v3 = vmul.f32 %v998_v0, %v998_v0  ;;  %v96_v4 = vmul.f32 %v1000_v1, %v1000_v1  ;;  %v1010_v6 = vld [vmem:[#allocation2 + $0x70] sm:$0xff]  ;;  %v1012_v7 = vld [vmem:[#allocation2 + $0x60] sm:$0xff]  ;;  %s655_s11 = sshll.u32 %s946_s10, 4  ;;  %s948_s3 = smov [#allocation10]   ;;  %s656_s11 = int_to_ptr.vmem [resolvable:$true] %s655_s11 }
  0x12   :  { %v94_v5 = vmul.f32 %v1002_v2, %v1002_v2  ;;  %v1014_v8 = vld [vmem:[#allocation2 + $0x50] sm:$0xff]  ;;  %v97_v9 = vmul.f32 %v1010_v6, %v1010_v6  ;;  %v95_v10 = vmul.f32 %v1012_v7, %v1012_v7  ;;  %v1022_v12 = vld [vmem:[#allocation2 + $0x48] sm:$0xff]  ;;  %v1024_v13 = vld [vmem:[#allocation2 + $0x40] sm:$0xff]  ;;  %s668_s12 = sshll.u32 %s948_s3, 4  ;;  %s670_s15 = sshll.u32 %s1460_s4, 4  ;;  %s669_s12 = int_to_ptr.vmem [resolvable:$true] %s668_s12  ;;  %s671_s15 = int_to_ptr.hbm [resolvable:$true] %s670_s15 }
  0x13   :  { %129 = vadd.xlane.f32.xlu0 %v98_v3  ;;  %125 = vadd.xlane.f32.xlu1 %v96_v4  ;;  %v93_v11 = vmul.f32 %v1014_v8, %v1014_v8  ;;  %v1026_v14 = vld [vmem:[#allocation2 + $0x38] sm:$0xff]  ;;  %v92_v15 = vmul.f32 %v1022_v12, %v1022_v12  ;;  %v91_v16 = vmul.f32 %v1024_v13, %v1024_v13  ;;  %v1034_v18 = vld [vmem:[#allocation2 + $0x30] sm:$0xff]  ;;  %v1036_v19 = vld [vmem:[#allocation2 + $0x28] sm:$0xff]  ;;  %s682_s18 = sshll.u32 %s1461_s5, 4  ;;  %s949_s4 = smov [#allocation12]   ;;  %s683_s18 = int_to_ptr.hbm [resolvable:$true] %s682_s18 }
  0x14   :  { %121 = vadd.xlane.f32.xlu2 %v94_v5  ;;  %v90_v17 = vmul.f32 %v1026_v14, %v1026_v14  ;;  %v1038_v20 = vld [vmem:[#allocation2 + $0x20] sm:$0xff]  ;;  %v89_v21 = vmul.f32 %v1034_v18, %v1034_v18  ;;  %v88_v22 = vmul.f32 %v1036_v19, %v1036_v19  ;;  %v1046_v24 = vld [vmem:[#allocation2 + $0x18] sm:$0xff]  ;;  %v1048_v25 = vld [vmem:[#allocation2 + $0x10] sm:$0xff] }
  0x15   :  { %v87_v23 = vmul.f32 %v1038_v20, %v1038_v20  ;;  %v1050_v26 = vld [vmem:[#allocation2 + $0x8] sm:$0xff]  ;;  %v86_v27 = vmul.f32 %v1046_v24, %v1046_v24  ;;  %v85_v28 = vmul.f32 %v1048_v25, %v1048_v25  ;;  %v1058_v30 = vld [vmem:[#allocation2] sm:$0xff] }
  0x16   :  { %v84_v29 = vmul.f32 %v1050_v26, %v1050_v26  ;;  %v83_v31 = vmul.f32 %v1058_v30, %v1058_v30 }
  0x1b   :  { %127 = vadd.xlane.f32.xlu0 %v97_v9  ;;  %123 = vadd.xlane.f32.xlu1 %v95_v10 }
  0x1c   :  { %119 = vadd.xlane.f32.xlu2 %v93_v11 }
  0x23   :  { %117 = vadd.xlane.f32.xlu0 %v92_v15  ;;  %115 = vadd.xlane.f32.xlu1 %v91_v16 }
  0x24   :  { %113 = vadd.xlane.f32.xlu2 %v90_v17 }
  0x2b   :  { %111 = vadd.xlane.f32.xlu0 %v89_v21  ;;  %109 = vadd.xlane.f32.xlu1 %v88_v22 }
  0x2c   :  { %107 = vadd.xlane.f32.xlu2 %v87_v23 }
  0x33   :  { %105 = vadd.xlane.f32.xlu0 %v86_v27  ;;  %103 = vadd.xlane.f32.xlu1 %v85_v28 }
  0x34   :  { %101 = vadd.xlane.f32.xlu2 %v84_v29 }
  0x3b   :  { %99 = vadd.xlane.f32.xlu0 %v83_v31 }
  0x86   :  { %v130_v32 = vpop.xlane.xlu0 %129  ;;  %v126_v33 = vpop.xlane.xlu1 %125 }
  0x87   :  { %v146_v34 = vmax.f32 %v130_v32, 1e-24  ;;  %v144_v35 = vmax.f32 %v126_v33, 1e-24  ;;  %v122_v36 = vpop.xlane.xlu2 %121 }
  0x88   :  { %v142_v37 = vmax.f32 %v122_v36, 1e-24 }
  0x89   :  { %765 = vrsqrt.f32 %v146_v34  ;;  %vm303_vm0 = vweird.f32 %v146_v34  ;;  %vm283_vm2 = vweird.f32 %v144_v35 }
  0x8a   :  { %767 = vrsqrt.f32 %v144_v35  ;;  %vm263_vm3 = vweird.f32 %v142_v37 }
  0x8b   :  { %769 = vrsqrt.f32 %v142_v37 }
  0x8e   :  { %v128_v38 = vpop.xlane.xlu0 %127  ;;  %v124_v39 = vpop.xlane.xlu1 %123 }
  0x8f   :  { %v766_v40 = vpop.eup %765  ;;  %v1062_v41 = vmax.f32 %v128_v38, 1e-24  ;;  %v1064_v42 = vmax.f32 %v124_v39, 1e-24  ;;  %v120_v43 = vpop.xlane.xlu2 %119 }
  0x90   :  { %v768_v44 = vpop.eup %767  ;;  %v298_v45 = vmul.f32 %v766_v40, %v146_v34  ;;  %v1066_v46 = vmax.f32 %v120_v43, 1e-24  ;;  %vm304_vm1 = vweird.f32 %v766_v40 }
  0x91   :  { %v770_v47 = vpop.eup %769  ;;  %v278_v48 = vmul.f32 %v768_v44, %v144_v35  ;;  %771 = vrsqrt.f32 %v1062_v41  ;;  %vm284_vm5 = vweird.f32 %v768_v44  ;;  %vm293_vm6 = vweird.f32 %v1062_v41  ;;  %vm1080_vm7 = vmor %vm303_vm0, %vm304_vm1 }
  0x92   :  { %v299_v49 = vmul.f32 %v766_v40, %v298_v45  ;;  %v258_v50 = vmul.f32 %v770_v47, %v142_v37  ;;  %773 = vrsqrt.f32 %v1064_v42  ;;  %vm264_vm4 = vweird.f32 %v770_v47  ;;  %vm285_vm10 = vmor %vm283_vm2, %vm284_vm5 }
  0x93   :  { %v279_v51 = vmul.f32 %v768_v44, %v278_v48  ;;  %775 = vrsqrt.f32 %v1066_v46  ;;  %vm273_vm8 = vweird.f32 %v1064_v42  ;;  %vm1091_vm9 = vmor %vm263_vm3, %vm264_vm4  ;;  %vm253_vm11 = vweird.f32 %v1066_v46 }
  0x94   :  { %v300_v52 = vmul.f32 0.5, %v299_v49  ;;  %v259_v53 = vmul.f32 %v770_v47, %v258_v50 }
  0x95   :  { %v280_v54 = vmul.f32 0.5, %v279_v51 }
  0x96   :  { %v301_v55 = vsub.f32 1.5, %v300_v52  ;;  %v260_v56 = vmul.f32 0.5, %v259_v53  ;;  %v118_v57 = vpop.xlane.xlu0 %117  ;;  %v116_v58 = vpop.xlane.xlu1 %115 }
  0x97   :  { %v1071_v59 = vpop.eup %771  ;;  %v281_v60 = vsub.f32 1.5, %v280_v54  ;;  %v1074_v61 = vmax.f32 %v118_v57, 1e-24  ;;  %v1098_v16 = vmax.f32 %v116_v58, 1e-24  ;;  %v114_v27 = vpop.xlane.xlu2 %113 }
  0x98   :  { %v1076_v62 = vpop.eup %773  ;;  %v302_v63 = vmul.f32 %v766_v40, %v301_v55  ;;  %v261_v4 = vsub.f32 1.5, %v260_v56  ;;  %v288_v5 = vmul.f32 %v1071_v59, %v1062_v41  ;;  %vm294_vm12 = vweird.f32 %v1071_v59 }
  0x99   :  { %v1087_v9 = vpop.eup %775  ;;  %v282_v10 = vmul.f32 %v768_v44, %v281_v60  ;;  %v268_v15 = vmul.f32 %v1076_v62, %v1064_v42  ;;  %777 = vrsqrt.f32 %v1074_v61  ;;  %v1128_v38 = vmax.f32 %v114_v27, 1e-24  ;;  %vm295_vm15 = vmor %vm293_vm6, %vm294_vm12 }
  0x9a   :  { %v306_v17 = vsel %vm1080_vm7, %v766_v40, %v302_v63  ;;  %v262_v21 = vmul.f32 %v770_v47, %v261_v4  ;;  %v289_v22 = vmul.f32 %v1071_v59, %v288_v5  ;;  %v248_v23 = vmul.f32 %v1087_v9, %v1066_v46 }
  0x9b   :  { %v1108_v28 = vmul.f32 %v306_v17, %v998_v0  ;;  %v286_v29 = vsel %vm285_vm10, %v768_v44, %v282_v10  ;;  %v269_v31 = vmul.f32 %v1076_v62, %v268_v15  ;;  %779 = vrsqrt.f32 %v1098_v16 }
  0x9c   :  { %v1113_v32 = vmul.f32 %v286_v29, %v1000_v1  ;;  %v266_v33 = vsel %vm1091_vm9, %v770_v47, %v262_v21  ;;  %v290_v34 = vmul.f32 0.5, %v289_v22  ;;  %v249_v35 = vmul.f32 %v1087_v9, %v248_v23 }
  0x9d   :  { %338 = vst [vmem:[#allocation9 + $0x78] sm:$0xff] %v1108_v28  ;;  %v1120_v36 = vmul.f32 %v266_v33, %v1002_v2  ;;  %v270_v0 = vmul.f32 0.5, %v269_v31  ;;  %423 = vmatpush.xpose.msra.mxu0 %v1108_v28  ;;  %704 = vmatpush.xpose.msra.mxu1 %v1108_v28  ;;  %vm254_vm13 = vweird.f32 %v1087_v9  ;;  %vm274_vm14 = vweird.f32 %v1076_v62  ;;  %v557_v33 = vld [vmem:[#allocation8 + $0x10] sm:$0xff] }
  0x9e   :  { %336 = vst [vmem:[#allocation9 + $0x68] sm:$0xff] %v1113_v32  ;;  %v291_v1 = vsub.f32 1.5, %v290_v34  ;;  %v250_v37 = vmul.f32 0.5, %v249_v35  ;;  %705 = vmatpush.xpose.msra.mxu2 %v1108_v28  ;;  %706 = vmatpush.xpose.msra.mxu3 %v1108_v28  ;;  %v112_v2 = vpop.xlane.xlu0 %111  ;;  %v110_v39 = vpop.xlane.xlu1 %109  ;;  %vm1152_vm0 = vmor %vm253_vm11, %vm254_vm13  ;;  %781 = vrsqrt.f32 %v1128_v38  ;;  %vm243_vm2 = vweird.f32 %v1074_v61 }
  0x9f   :  { %v1132_v40 = vpop.eup %777  ;;  %334 = vst [vmem:[#allocation9 + $0x58] sm:$0xff] %v1120_v36  ;;  %v271_v43 = vsub.f32 1.5, %v270_v0  ;;  %v1136_v44 = vmax.f32 %v112_v2, 1e-24  ;;  %v1138_v45 = vmax.f32 %v110_v39, 1e-24  ;;  %vm275_vm1 = vmor %vm273_vm8, %vm274_vm14  ;;  %v108_v54 = vpop.xlane.xlu2 %107  ;;  %vm233_vm4 = vweird.f32 %v1098_v16 }
  0xa0   :  { %v292_v47 = vmul.f32 %v1071_v59, %v291_v1  ;;  %v251_v48 = vsub.f32 1.5, %v250_v37  ;;  %v238_v49 = vmul.f32 %v1132_v40, %v1074_v61  ;;  %v1184_v60 = vmax.f32 %v108_v54, 1e-24 }
  0xa1   :  { %v272_v50 = vmul.f32 %v1076_v62, %v271_v43  ;;  %783 = vrsqrt.f32 %v1136_v44  ;;  %v1163_v55 = vpop.eup %779  ;;  %vm244_vm3 = vweird.f32 %v1132_v40  ;;  %vm223_vm7 = vweird.f32 %v1128_v38 }
  0xa2   :  { %v296_v52 = vsel %vm295_vm15, %v1071_v59, %v292_v47  ;;  %v252_v41 = vmul.f32 %v1087_v9, %v251_v48  ;;  %v239_v53 = vmul.f32 %v1132_v40, %v238_v49  ;;  %785 = vrsqrt.f32 %v1138_v45  ;;  %vm245_vm6 = vmor %vm243_vm2, %vm244_vm3 }
  0xa3   :  { %v1166_v46 = vmul.f32 %v296_v52, %v1010_v6  ;;  %v276_v56 = vsel %vm275_vm1, %v1076_v62, %v272_v50  ;;  %v228_v59 = vmul.f32 %v1163_v55, %v1098_v16  ;;  %787 = vrsqrt.f32 %v1184_v60 }
  0xa4   :  { %v1171_v57 = vmul.f32 %v276_v56, %v1012_v7  ;;  %v256_v42 = vsel %vm1152_vm0, %v1087_v9, %v252_v41  ;;  %v240_v58 = vmul.f32 0.5, %v239_v53  ;;  %v1192_v3 = vpop.eup %781  ;;  %vm234_vm5 = vweird.f32 %v1163_v55 }
  0xa5   :  { %337 = vst [vmem:[#allocation9 + $0x70] sm:$0xff] %v1166_v46  ;;  %v1180_v6 = vmul.f32 %v256_v42, %v1014_v8  ;;  %424 = vmatpush.xpose.msra.mxu0 %v1166_v46  ;;  %707 = vmatpush.xpose.msra.mxu1 %v1166_v46  ;;  %v229_v62 = vmul.f32 %v1163_v55, %v228_v59  ;;  %vm213_vm8 = vweird.f32 %v1136_v44  ;;  %vm1233_vm9 = vmor %vm233_vm4, %vm234_vm5  ;;  %vm203_vm10 = vweird.f32 %v1138_v45 }
  0xa6   :  { %335 = vst [vmem:[#allocation9 + $0x60] sm:$0xff] %v1171_v57  ;;  %v241_v7 = vsub.f32 1.5, %v240_v58  ;;  %708 = vmatpush.xpose.msra.mxu2 %v1166_v46  ;;  %709 = vmatpush.xpose.msra.mxu3 %v1166_v46  ;;  %v106_v8 = vpop.xlane.xlu0 %105  ;;  %v104_v63 = vpop.xlane.xlu1 %103  ;;  %v218_v15 = vmul.f32 %v1192_v3, %v1128_v38  ;;  %vm224_vm11 = vweird.f32 %v1192_v3  ;;  %vm193_vm15 = vweird.f32 %v1184_v60 }
  0xa7   :  { %333 = vst [vmem:[#allocation9 + $0x50] sm:$0xff] %v1180_v6  ;;  %v1197_v4 = vmax.f32 %v106_v8, 1e-24  ;;  %v1199_v5 = vmax.f32 %v104_v63, 1e-24  ;;  %v1201_v9 = vpop.eup %783  ;;  %v230_v11 = vmul.f32 0.5, %v229_v62  ;;  %v102_v29 = vpop.xlane.xlu2 %101  ;;  %vm1268_vm14 = vmor %vm223_vm7, %vm224_vm11 }
  0xa8   :  { %v242_v10 = vmul.f32 %v1132_v40, %v241_v7  ;;  %v1207_v17 = vpop.eup %785  ;;  %v208_v21 = vmul.f32 %v1201_v9, %v1136_v44  ;;  %v219_v27 = vmul.f32 %v1192_v3, %v218_v15  ;;  %vm214_vm12 = vweird.f32 %v1201_v9 }
  0xa9   :  { %425 = vmatpush.xpose.msra.mxu0 %v1113_v32  ;;  %710 = vmatpush.xpose.msra.mxu1 %v1113_v32  ;;  %789 = vrsqrt.f32 %v1197_v4  ;;  %v231_v23 = vsub.f32 1.5, %v230_v11  ;;  %v198_v61 = vmul.f32 %v1207_v17, %v1138_v45  ;;  %v1243_v1 = vpop.eup %787  ;;  %vm204_vm13 = vweird.f32 %v1207_v17  ;;  %vm1279_vm0 = vmor %vm213_vm8, %vm214_vm12 }
  0xaa   :  { %v246_v22 = vsel %vm245_vm6, %v1132_v40, %v242_v10  ;;  %711 = vmatpush.xpose.msra.mxu2 %v1113_v32  ;;  %712 = vmatpush.xpose.msra.mxu3 %v1113_v32  ;;  %v209_v34 = vmul.f32 %v1201_v9, %v208_v21  ;;  %791 = vrsqrt.f32 %v1199_v5  ;;  %v220_v0 = vmul.f32 0.5, %v219_v27  ;;  %vm1294_vm1 = vmor %vm203_vm10, %vm204_vm13 }
  0xab   :  { %v1227_v31 = vmul.f32 %v246_v22, %v1022_v12  ;;  %v232_v35 = vmul.f32 %v1163_v55, %v231_v23  ;;  %v199_v12 = vmul.f32 %v1207_v17, %v198_v61  ;;  %v1250_v37 = vmax.f32 %v102_v29, 1e-24 }
  0xac   :  { %v210_v16 = vmul.f32 0.5, %v209_v34  ;;  %v221_v39 = vsub.f32 1.5, %v220_v0  ;;  %v188_v43 = vmul.f32 %v1243_v1, %v1184_v60  ;;  %vm194_vm2 = vweird.f32 %v1243_v1 }
  0xad   :  { %332 = vst [vmem:[#allocation9 + $0x48] sm:$0xff] %v1227_v31  ;;  %426 = vmatpush.xpose.msra.mxu0 %v1171_v57  ;;  %713 = vmatpush.xpose.msra.mxu1 %v1171_v57  ;;  %v236_v2 = vsel %vm1233_vm9, %v1163_v55, %v232_v35  ;;  %v200_v40 = vmul.f32 0.5, %v199_v12  ;;  %793 = vrsqrt.f32 %v1250_v37  ;;  %vm183_vm3 = vweird.f32 %v1197_v4  ;;  %vm1334_vm5 = vmor %vm193_vm15, %vm194_vm2 }
  0xae   :  { %714 = vmatpush.xpose.msra.mxu2 %v1171_v57  ;;  %715 = vmatpush.xpose.msra.mxu3 %v1171_v57  ;;  %v100_v47 = vpop.xlane.xlu0 %99  ;;  %v1262_v49 = vmul.f32 %v236_v2, %v1024_v13  ;;  %v211_v51 = vsub.f32 1.5, %v210_v16  ;;  %v222_v52 = vmul.f32 %v1192_v3, %v221_v39  ;;  %v189_v41 = vmul.f32 %v1243_v1, %v188_v43 }
  0xaf   :  { %v1259_v48 = vpop.eup %789  ;;  %v201_v38 = vsub.f32 1.5, %v200_v40  ;;  %v1302_v56 = vmax.f32 %v100_v47, 1e-24  ;;  %vm173_vm7 = vweird.f32 %v1199_v5  ;;  %vm163_vm10 = vweird.f32 %v1250_v37 }
  0xb0   :  { %v178_v53 = vmul.f32 %v1259_v48, %v1197_v4  ;;  %v1286_v54 = vpop.eup %791  ;;  %331 = vst [vmem:[#allocation9 + $0x40] sm:$0xff] %v1262_v49  ;;  %v212_v55 = vmul.f32 %v1201_v9, %v211_v51  ;;  %v226_v42 = vsel %vm1268_vm14, %v1192_v3, %v222_v52  ;;  %v190_v58 = vmul.f32 0.5, %v189_v41 }
  0xb1   :  { %427 = vmatpush.xpose.msra.mxu0 %v1120_v36  ;;  %716 = vmatpush.xpose.msra.mxu1 %v1120_v36  ;;  %v202_v45 = vmul.f32 %v1207_v17, %v201_v38  ;;  %v1312_v7 = vmul.f32 %v226_v42, %v1026_v14  ;;  %vm184_vm4 = vweird.f32 %v1259_v48  ;;  %v168_v8 = vmul.f32 %v1286_v54, %v1199_v5 }
  0xb2   :  { %v179_v59 = vmul.f32 %v1259_v48, %v178_v53  ;;  %717 = vmatpush.xpose.msra.mxu2 %v1120_v36  ;;  %718 = vmatpush.xpose.msra.mxu3 %v1120_v36  ;;  %v216_v62 = vsel %vm1279_vm0, %v1201_v9, %v212_v55  ;;  %v191_v10 = vsub.f32 1.5, %v190_v58  ;;  %795 = vrsqrt.f32 %v1302_v56  ;;  %vm1352_vm6 = vmor %vm183_vm3, %vm184_vm4 }
  0xb3   :  { %v1321_v63 = vmul.f32 %v216_v62, %v1034_v18  ;;  %v206_v3 = vsel %vm1294_vm1, %v1207_v17, %v202_v45  ;;  %v794_v14 = vpop.eup %793  ;;  %330 = vst [vmem:[#allocation9 + $0x38] sm:$0xff] %v1312_v7  ;;  %v169_v18 = vmul.f32 %v1286_v54, %v168_v8  ;;  %vm174_vm8 = vweird.f32 %v1286_v54 }
  0xb4   :  { %v180_v11 = vmul.f32 0.5, %v179_v59  ;;  %v1328_v15 = vmul.f32 %v206_v3, %v1036_v19  ;;  %v192_v19 = vmul.f32 %v1243_v1, %v191_v10  ;;  %v158_v21 = vmul.f32 %v794_v14, %v1250_v37  ;;  %vm1370_vm9 = vmor %vm173_vm7, %vm174_vm8 }
  0xb5   :  { %428 = vmatpush.xpose.msra.mxu0 %v1180_v6  ;;  %719 = vmatpush.xpose.msra.mxu1 %v1180_v6  ;;  %329 = vst [vmem:[#allocation9 + $0x30] sm:$0xff] %v1321_v63  ;;  %v170_v22 = vmul.f32 0.5, %v169_v18  ;;  %vm164_vm11 = vweird.f32 %v794_v14  ;;  %vm153_vm13 = vweird.f32 %v1302_v56  ;;  %v947_v62 = vmov 45.0  }
  0xb6   :  { %v181_v17 = vsub.f32 1.5, %v180_v11  ;;  %720 = vmatpush.xpose.msra.mxu2 %v1180_v6  ;;  %721 = vmatpush.xpose.msra.mxu3 %v1180_v6  ;;  %328 = vst [vmem:[#allocation9 + $0x28] sm:$0xff] %v1328_v15  ;;  %v196_v23 = vsel %vm1334_vm5, %v1243_v1, %v192_v19  ;;  %v159_v61 = vmul.f32 %v794_v14, %v158_v21  ;;  %vm165_vm12 = vmor %vm163_vm10, %vm164_vm11  ;;  %797 = vrcp.f32 %v947_v62 }
  0xb7   :  { %v1363_v29 = vmul.f32 %v196_v23, %v1038_v20  ;;  %v171_v4 = vsub.f32 1.5, %v170_v22  ;;  %v539_v22 = vld [vmem:[#allocation6] sm:$0xff]  ;;  %v540_v23 = vld [vmem:[#allocation6 + $0x8] sm:$0xff]  ;;  %vm573_vm10 = vcmp.gt.f32.partialorder %v557_v33, 0.0 }
  0xb8   :  { %v182_v27 = vmul.f32 %v1259_v48, %v181_v17  ;;  %v160_v34 = vmul.f32 0.5, %v159_v61  ;;  %v796_v20 = vpop.eup %795  ;;  %v542_v61 = vld [vmem:[#allocation6 + $0x18] sm:$0xff] }
  0xb9   :  { %429 = vmatpush.xpose.msra.mxu0 %v1227_v31  ;;  %722 = vmatpush.xpose.msra.mxu1 %v1227_v31  ;;  %327 = vst [vmem:[#allocation9 + $0x20] sm:$0xff] %v1363_v29  ;;  %v172_v0 = vmul.f32 %v1286_v54, %v171_v4  ;;  %v148_v1 = vmul.f32 %v796_v20, %v1302_v56  ;;  %vm154_vm14 = vweird.f32 %v796_v20  ;;  %v555_v4 = vld [vmem:[#allocation8] sm:$0xff] }
  0xba   :  { %v186_v5 = vsel %vm1352_vm6, %v1259_v48, %v182_v27  ;;  %723 = vmatpush.xpose.msra.mxu2 %v1227_v31  ;;  %724 = vmatpush.xpose.msra.mxu3 %v1227_v31  ;;  %v161_v12 = vsub.f32 1.5, %v160_v34  ;;  %vm155_vm15 = vmor %vm153_vm13, %vm154_vm14  ;;  %v541_v27 = vld [vmem:[#allocation6 + $0x10] sm:$0xff]  ;;  %v544_v34 = vld [vmem:[#allocation6 + $0x28] sm:$0xff]  ;;  %vm571_vm8 = vcmp.gt.f32.partialorder %v555_v4, 0.0 }
  0xbb   :  { %v1379_v35 = vmul.f32 %v186_v5, %v1046_v24  ;;  %v176_v16 = vsel %vm1370_vm9, %v1286_v54, %v172_v0  ;;  %v149_v2 = vmul.f32 %v796_v20, %v148_v1  ;;  %v556_v5 = vld [vmem:[#allocation8 + $0x8] sm:$0xff]  ;;  %v587_v0 = vmax.f32 %v539_v22, 0.0 }
  0xbc   :  { %v309_v37 = vmul.f32 %v176_v16, %v1048_v25  ;;  %v162_v24 = vmul.f32 %v794_v14, %v161_v12  ;;  %v798_v8 = vpop.eup %797  ;;  %v588_v12 = vmax.f32 %v540_v23, 0.0  ;;  %v589_v1 = vmax.f32 %v541_v27, 0.0  ;;  %v559_v16 = vld [vmem:[#allocation8 + $0x20] sm:$0xff] }
  0xbd   :  { %326 = vst [vmem:[#allocation9 + $0x18] sm:$0xff] %v1379_v35  ;;  %430 = vmatpush.xpose.msra.mxu0 %v1262_v49  ;;  %725 = vmatpush.xpose.msra.mxu1 %v1262_v49  ;;  %v150_v40 = vmul.f32 0.5, %v149_v2  ;;  %vm533_vm7 = vweird.f32 %v798_v8  ;;  %v603_v2 = vmin.f32 %v539_v22, 0.0  ;;  %vm572_vm9 = vcmp.gt.f32.partialorder %v556_v5, 0.0 }
  0xbe   :  { %726 = vmatpush.xpose.msra.mxu2 %v1262_v49  ;;  %727 = vmatpush.xpose.msra.mxu3 %v1262_v49  ;;  %325 = vst [vmem:[#allocation9 + $0x10] sm:$0xff] %v309_v37  ;;  %v166_v39 = vsel %vm165_vm12, %v794_v14, %v162_v24  ;;  %v590_v24 = vmax.f32 %v542_v61, 0.0  ;;  %vm575_vm12 = vcmp.gt.f32.partialorder %v559_v16, 0.0 }
  0xbf   :  { %v308_v43 = vmul.f32 %v166_v39, %v1050_v26  ;;  %v151_v47 = vsub.f32 1.5, %v150_v40  ;;  %v604_v39 = vmin.f32 %v540_v23, 0.0  ;;  %v605_v40 = vmin.f32 %v541_v27, 0.0  ;;  %v570_v27 = vld [vmem:[#allocation8 + $0x78] sm:$0xff] }
  0xc1   :  { %431 = vmatpush.xpose.msra.mxu0 %v1312_v7  ;;  %728 = vmatpush.xpose.msra.mxu1 %v1312_v7  ;;  %324 = vst [vmem:[#allocation9 + $0x8] sm:$0xff] %v308_v43  ;;  %v152_v25 = vmul.f32 %v796_v20, %v151_v47  ;;  %v546_v47 = vld [vmem:[#allocation6 + $0x38] sm:$0xff] }
  0xc2   :  { %729 = vmatpush.xpose.msra.mxu2 %v1312_v7  ;;  %730 = vmatpush.xpose.msra.mxu3 %v1312_v7 }
  0xc3   :  { %v156_v48 = vsel %vm155_vm15, %v796_v20, %v152_v25  ;;  %v545_v20 = vld [vmem:[#allocation6 + $0x30] sm:$0xff] }
  0xc4   :  { %v307_v26 = vmul.f32 %v156_v48, %v1058_v30  ;;  %v339_v30 = vlaneseq  ;;  %v561_v25 = vld [vmem:[#allocation8 + $0x30] sm:$0xff] }
  0xc5   :  { %432 = vmatpush.xpose.msra.mxu0 %v1321_v63  ;;  %731 = vmatpush.xpose.msra.mxu1 %v1321_v63  ;;  %vm577_vm14 = vcmp.gt.f32.partialorder %v561_v25, 0.0 }
  0xc6   :  { %732 = vmatpush.xpose.msra.mxu2 %v1321_v63  ;;  %733 = vmatpush.xpose.msra.mxu3 %v1321_v63  ;;  %323 = vst [vmem:[#allocation9] sm:$0xff] %v307_v26  ;;  %v357_v50 = vand.u32 127, %v339_v30 }
  0xc7   :  { %663 = dma.vmem_to_hbm [thread:$0]  %s656_s11, 2048, %s658_s9, [#allocation4], %s942_s26, %s942_s26, %s943_s27  }
  0xc8   :  { %vm406_vm3 = vcmp.lt.s32.totalorder %v357_v50, 10 }
  0xc9   :  { %433 = vmatpush.xpose.msra.mxu0 %v1328_v15  ;;  %734 = vmatpush.xpose.msra.mxu1 %v1328_v15 }
  0xca   :  { %735 = vmatpush.xpose.msra.mxu2 %v1328_v15  ;;  %736 = vmatpush.xpose.msra.mxu3 %v1328_v15 }
  0xcd   :  { %434 = vmatpush.xpose.msra.mxu0 %v1363_v29  ;;  %737 = vmatpush.xpose.msra.mxu1 %v1363_v29 }
  0xce   :  { %738 = vmatpush.xpose.msra.mxu2 %v1363_v29  ;;  %739 = vmatpush.xpose.msra.mxu3 %v1363_v29 }
  0xd1   :  { %435 = vmatpush.xpose.msra.mxu0 %v1379_v35  ;;  %740 = vmatpush.xpose.msra.mxu1 %v1379_v35 }
  0xd2   :  { %741 = vmatpush.xpose.msra.mxu2 %v1379_v35  ;;  %742 = vmatpush.xpose.msra.mxu3 %v1379_v35 }
  0xd5   :  { %436 = vmatpush.xpose.msra.mxu0 %v309_v37  ;;  %743 = vmatpush.xpose.msra.mxu1 %v309_v37 }
  0xd6   :  { %744 = vmatpush.xpose.msra.mxu2 %v309_v37  ;;  %745 = vmatpush.xpose.msra.mxu3 %v309_v37 }
  0xd9   :  { %437 = vmatpush.xpose.msra.mxu0 %v308_v43  ;;  %746 = vmatpush.xpose.msra.mxu1 %v308_v43 }
  0xda   :  { %747 = vmatpush.xpose.msra.mxu2 %v308_v43  ;;  %748 = vmatpush.xpose.msra.mxu3 %v308_v43 }
  0xdd   :  { %438 = vmatpush.xpose.msra.mxu0 %v307_v26  ;;  %749 = vmatpush.xpose.msra.mxu1 %v307_v26 }
  0xde   :  { %750 = vmatpush.xpose.msra.mxu2 %v307_v26  ;;  %751 = vmatpush.xpose.msra.mxu3 %v307_v26 }
  0xe0   :  { %439 = vmatmul.f32.vlgmr.msra.gmra.mxu0 %v307_v26  ;;  %451 = vmatmul.f32.vlgmr.msra.gmra.mxu1 %v1363_v29  ;;  %v543_v29 = vld [vmem:[#allocation6 + $0x20] sm:$0xff]  ;;  %v592_v26 = vmax.f32 %v544_v34, 0.0 }
  0xe1   :  { %463 = vmatmul.f32.vlgmr.msra.gmra.mxu2 %v1262_v49  ;;  %475 = vmatmul.f32.vlgmr.msra.gmra.mxu3 %v1171_v57  ;;  %v340_v57 = vshrl.u32 %v339_v30, 7  ;;  %v591_v48 = vmax.f32 %v543_v29, 0.0  ;;  %v607_v30 = vmin.f32 %v543_v29, 0.0 }
  0xe3   :  { %vm358_vm2 = vcmp.gt.s32.totalorder %v357_v50, %v340_v57 }
  0xe4   :  { %vm407_vm5 = vmand %vm358_vm2, %vm406_vm3 }
  0xe8   :  { %442 = vmatmul.f32.gmra.mxu0 %v308_v43  ;;  %454 = vmatmul.f32.gmra.mxu1 %v1328_v15  ;;  %v606_v43 = vmin.f32 %v542_v61, 0.0 }
  0xe9   :  { %466 = vmatmul.f32.gmra.mxu2 %v1227_v31  ;;  %478 = vmatmul.f32.gmra.mxu3 %v1113_v32  ;;  %v341_v31 = vadd.s32 8, %v340_v57  ;;  %v547_v57 = vld [vmem:[#allocation6 + $0x40] sm:$0xff] }
  0xeb   :  { %vm359_vm0 = vcmp.gt.s32.totalorder %v357_v50, %v341_v31  ;;  %vm375_vm1 = vcmp.lt.s32.totalorder %v341_v31, 10  ;;  %v562_v31 = vld [vmem:[#allocation8 + $0x38] sm:$0xff]  ;;  %v548_v50 = vld [vmem:[#allocation6 + $0x48] sm:$0xff] }
  0xec   :  { %vm391_vm4 = vmand %vm359_vm0, %vm375_vm1  ;;  %vm578_vm15 = vcmp.gt.f32.partialorder %v562_v31, 0.0 }
  0xed   :  { %vm408_vm6 = vmand %vm391_vm4, %vm406_vm3 }
  0xf0   :  { %445 = vmatmul.f32.gmra.mxu0 %v309_v37  ;;  %457 = vmatmul.f32.gmra.mxu1 %v1321_v63  ;;  %v529_v63 = vmul.f32 45.0, %v798_v8  ;;  %v560_v37 = vld [vmem:[#allocation8 + $0x28] sm:$0xff] }
  0xf1   :  { %469 = vmatmul.f32.gmra.mxu2 %v1180_v6  ;;  %481 = vmatmul.f32.gmra.mxu3 %v1166_v46  ;;  %vm576_vm13 = vcmp.gt.f32.partialorder %v560_v37, 0.0 }
  0xf2   :  { %v530_v3 = vsub.f32 1.0, %v529_v63  ;;  %v567_v63 = vld [vmem:[#allocation8 + $0x60] sm:$0xff] }
  0xf3   :  { %vm583_vm4 = vcmp.gt.f32.partialorder %v567_v63, 0.0 }
  0xf4   :  { %v531_v15 = vmul.f32 %v798_v8, %v530_v3 }
  0xf6   :  { %v532_v19 = vadd.f32 %v798_v8, %v531_v15  ;;  %v568_v15 = vld [vmem:[#allocation8 + $0x68] sm:$0xff] }
  0xf8   :  { %448 = vmatmul.f32.gmra.mxu0 %v1379_v35  ;;  %460 = vmatmul.f32.gmra.mxu1 %v1312_v7  ;;  %v534_v60 = vsel %vm533_vm7, %v798_v8, %v532_v19  ;;  %v558_v35 = vld [vmem:[#allocation8 + $0x18] sm:$0xff]  ;;  %v552_v8 = vld [vmem:[#allocation6 + $0x68] sm:$0xff]  ;;  %vm586_vm7 = vcmp.gt.f32.partialorder %v570_v27, 0.0 }
  0xf9   :  { %472 = vmatmul.f32.gmra.mxu2 %v1120_v36  ;;  %484 = vmatmul.f32.gmra.mxu3 %v1108_v28  ;;  %vm574_vm11 = vcmp.gt.f32.partialorder %v558_v35, 0.0  ;;  %v600_v61 = vmax.f32 %v552_v8, 0.0  ;;  %v616_v29 = vmin.f32 %v552_v8, 0.0 }
 0x15d   :  { %v440_v49 = vpop.f32.mrf.mxu0  ;;  %v452_v32 = vpop.f32.mrf.mxu1 }
 0x15e   :  { %v441_v46 = vadd.f32 1.0, %v440_v49  ;;  %v593_v49 = vmax.f32 %v545_v20, 0.0  ;;  %v608_v32 = vmin.f32 %v544_v34, 0.0 }
 0x160   :  { %v488_v28 = vsel %vm407_vm5, %v441_v46, 0.0  ;;  %v563_v46 = vld [vmem:[#allocation8 + $0x40] sm:$0xff]  ;;  %v624_v62 = vsel %vm576_vm13, %v592_v26, %v608_v32  ;;  %vm584_vm5 = vcmp.gt.f32.partialorder %v568_v15, 0.0 }
 0x161   :  { %vm579_vm0 = vcmp.gt.f32.partialorder %v563_v46, 0.0  ;;  %640 = vst [vmem:[#allocation10 + $0x28] sm:$0xff] %v624_v62 }
 0x164   :  { %v464_v6 = vpop.f32.mrf.mxu2  ;;  %v476_v51 = vpop.f32.mrf.mxu3 }
 0x165   :  { %v443_v52 = vpop.f32.mrf.mxu0  ;;  %v455_v13 = vpop.f32.mrf.mxu1  ;;  %v609_v6 = vmin.f32 %v545_v20, 0.0  ;;  %v619_v51 = vsel %vm571_vm8, %v587_v0, %v603_v2 }
 0x166   :  { %v444_v36 = vadd.f32 1.0, %v443_v52  ;;  %v620_v52 = vsel %vm572_vm9, %v588_v12, %v604_v39  ;;  %v621_v13 = vsel %vm573_vm10, %v589_v1, %v605_v40  ;;  %635 = vst [vmem:[#allocation10] sm:$0xff] %v619_v51  ;;  %v632_v1 = vsel %vm584_vm5, %v600_v61, %v616_v29 }
 0x167   :  { %636 = vst [vmem:[#allocation10 + $0x8] sm:$0xff] %v620_v52 }
 0x168   :  { %v489_v38 = vsel %vm408_vm6, %v444_v36, 0.0  ;;  %v549_v36 = vld [vmem:[#allocation6 + $0x50] sm:$0xff]  ;;  %637 = vst [vmem:[#allocation10 + $0x10] sm:$0xff] %v621_v13 }
 0x169   :  { %v504_v41 = vadd.f32 %v489_v38, %v488_v28  ;;  %v564_v28 = vld [vmem:[#allocation8 + $0x48] sm:$0xff]  ;;  %v594_v38 = vmax.f32 %v546_v47, 0.0  ;;  %v597_v3 = vmax.f32 %v549_v36, 0.0  ;;  %648 = vst [vmem:[#allocation10 + $0x68] sm:$0xff] %v632_v1 }
 0x16a   :  { %vm580_vm1 = vcmp.gt.f32.partialorder %v564_v28, 0.0 }
 0x16b   :  { %519 = vadd.xlane.f32.xlu1 %v504_v41  ;;  %v610_v41 = vmin.f32 %v546_v47, 0.0 }
 0x16c   :  { %v467_v53 = vpop.f32.mrf.mxu2  ;;  %v479_v54 = vpop.f32.mrf.mxu3 }
 0x16d   :  { %v446_v55 = vpop.f32.mrf.mxu0  ;;  %v458_v44 = vpop.f32.mrf.mxu1  ;;  %v622_v53 = vsel %vm574_vm11, %v590_v24, %v606_v43  ;;  %v550_v54 = vld [vmem:[#allocation6 + $0x58] sm:$0xff]  ;;  %v626_v19 = vsel %vm578_vm15, %v594_v38, %v610_v41 }
 0x16e   :  { %v565_v55 = vld [vmem:[#allocation8 + $0x50] sm:$0xff]  ;;  %v595_v44 = vmax.f32 %v547_v57, 0.0  ;;  %638 = vst [vmem:[#allocation10 + $0x18] sm:$0xff] %v622_v53 }
 0x16f   :  { %vm581_vm2 = vcmp.gt.f32.partialorder %v565_v55, 0.0  ;;  %642 = vst [vmem:[#allocation10 + $0x38] sm:$0xff] %v626_v19 }
 0x174   :  { %v470_v56 = vpop.f32.mrf.mxu2  ;;  %v482_v42 = vpop.f32.mrf.mxu3 }
 0x175   :  { %v449_v45 = vpop.f32.mrf.mxu0  ;;  %v461_v58 = vpop.f32.mrf.mxu1  ;;  %v611_v56 = vmin.f32 %v547_v57, 0.0  ;;  %v623_v42 = vsel %vm575_vm12, %v591_v48, %v607_v30 }
 0x176   :  { %v551_v45 = vld [vmem:[#allocation6 + $0x60] sm:$0xff]  ;;  %v566_v58 = vld [vmem:[#allocation8 + $0x58] sm:$0xff]  ;;  %639 = vst [vmem:[#allocation10 + $0x20] sm:$0xff] %v623_v42 }
 0x177   :  { %vm582_vm3 = vcmp.gt.f32.partialorder %v566_v58, 0.0  ;;  %v615_v22 = vmin.f32 %v551_v45, 0.0  ;;  %v627_v23 = vsel %vm579_vm0, %v595_v44, %v611_v56 }
 0x178   :  { %643 = vst [vmem:[#allocation10 + $0x40] sm:$0xff] %v627_v23 }
 0x17c   :  { %v473_v59 = vpop.f32.mrf.mxu2  ;;  %v485_v7 = vpop.f32.mrf.mxu3 }
 0x17d   :  { %v596_v59 = vmax.f32 %v548_v50, 0.0  ;;  %v612_v7 = vmin.f32 %v548_v50, 0.0 }
 0x17f   :  { %v628_v4 = vsel %vm580_vm1, %v596_v59, %v612_v7 }
 0x180   :  { %644 = vst [vmem:[#allocation10 + $0x48] sm:$0xff] %v628_v4 }
 0x1de   :  { %v520_v10 = vpop.xlane.xlu1 %519 }
 0x1df   :  { %v521_v11 = vrot.slane %v520_v10, 4 }
 0x1e1   :  { %v522_v14 = vadd.f32 %v521_v11, %v520_v10  ;;  %v613_v10 = vmin.f32 %v549_v36, 0.0  ;;  %v625_v11 = vsel %vm577_vm14, %v593_v49, %v609_v6 }
 0x1e2   :  { %641 = vst [vmem:[#allocation10 + $0x30] sm:$0xff] %v625_v11 }
 0x1e3   :  { %v523_v9 = vrot.slane %v522_v14, 2  ;;  %v629_v34 = vsel %vm581_vm2, %v597_v3, %v613_v10 }
 0x1e4   :  { %645 = vst [vmem:[#allocation10 + $0x50] sm:$0xff] %v629_v34 }
 0x1e5   :  { %v524_v18 = vadd.f32 %v523_v9, %v522_v14  ;;  %v553_v14 = vld [vmem:[#allocation6 + $0x70] sm:$0xff]  ;;  %v598_v9 = vmax.f32 %v550_v54, 0.0 }
 0x1e6   :  { %v601_v5 = vmax.f32 %v553_v14, 0.0  ;;  %v617_v33 = vmin.f32 %v553_v14, 0.0 }
 0x1e7   :  { %v525_v17 = vrot.slane %v524_v18, 1 }
 0x1e9   :  { %v526_v21 = vadd.f32 %v525_v17, %v524_v18  ;;  %v614_v18 = vmin.f32 %v550_v54, 0.0  ;;  %v554_v17 = vld [vmem:[#allocation6 + $0x78] sm:$0xff] }
 0x1ea   :  { %v602_v20 = vmax.f32 %v554_v17, 0.0  ;;  %v618_v35 = vmin.f32 %v554_v17, 0.0 }
 0x1eb   :  { %752 = vpush %v526_v21  ;;  %v569_v21 = vld [vmem:[#allocation8 + $0x70] sm:$0xff]  ;;  %v630_v0 = vsel %vm582_vm3, %v598_v9, %v614_v18 }
 0x1ec   :  { %754 = vpush %v534_v60  ;;  %v599_v60 = vmax.f32 %v551_v45, 0.0  ;;  %vm585_vm6 = vcmp.gt.f32.partialorder %v569_v21, 0.0  ;;  %v634_v37 = vsel %vm586_vm7, %v602_v20, %v618_v35 }
 0x1ed   :  { %v633_v16 = vsel %vm585_vm6, %v601_v5, %v617_v33  ;;  %646 = vst [vmem:[#allocation10 + $0x58] sm:$0xff] %v630_v0 }
 0x1ee   :  { %v631_v12 = vsel %vm583_vm4, %v599_v60, %v615_v22  ;;  %649 = vst [vmem:[#allocation10 + $0x70] sm:$0xff] %v633_v16 }
 0x1ef   :  { %647 = vst [vmem:[#allocation10 + $0x60] sm:$0xff] %v631_v12 }
 0x1f0   :  { %650 = vst [vmem:[#allocation10 + $0x78] sm:$0xff] %v634_v37 }
 0x1f1   :  { %676 = dma.vmem_to_hbm [thread:$0]  %s669_s12, 2048, %s671_s15, [#allocation11], %s942_s26, %s942_s26, %s943_s27  }
 0x21c   :  { %s753_s19 = spop %752 }
 0x21d   :  { %s755_s20 = spop %754 }
 0x21e   :  { %s536_s21 = smul.f32 %s755_s20, %s753_s19 }
 0x220   :  { %538 = sst [smem:[#allocation12]] %s536_s21 }
 0x221   :  { %685 = dma.smem_to_hbm %s949_s4, 16, %s683_s18, [#allocation5]  }
 0x222   :  { %935 = dma.done.wait [#allocation4], 2048  }
 0x223   :  { %936 = vsyncadd [#allocation4], 4294965248 }
 0x224   :  { %937 = dma.done.wait [#allocation11], 2048  }
 0x225   :  { %938 = vsyncadd [#allocation11], 4294965248 }
 0x226   :  { %939 = dma.done.wait [#allocation5], 16  }
 0x227   :  { %940 = vsyncadd [#allocation5], 4294967280 }
 0x228   :  { %698 = sfence }
 0x229   :  { %699 = vsyncpa [#allocation3], 1 }
 0x22a   :  { %700 = vsyncpa [#allocation7], 1 }
 0x22b   :  { %701 = vsyncpa [#allocation4], 1 }
 0x22c   :  { %702 = vsyncpa [#allocation11], 1 }
 0x22d   :  { %703 = vsyncpa [#allocation5], 1 }

</bundles_post_ra>
